<compile_context>
chip_gen: v6e
topology: v6e:2x2x1
jax: 0.10.0
libtpu: 0.0.40
codegen_flags: <defaults>
</compile_context>

<pallas_src>
import math

import jax
import jax.numpy as jnp
from jax.experimental import pallas as pl
from jax.experimental.pallas import tpu as pltpu


def _mlp_kernel(x_ref, w1_ref, b1_ref, w2_ref, b2_ref, o_ref):
    # fc1 on the MXU: bf16 inputs, f32 accumulation.
    h = jnp.dot(x_ref[...], w1_ref[...], preferred_element_type=jnp.float32)
    # Bias add + ReLU in f32 (v5e VPU has no bf16 path; f32 is also exact).
    h = jnp.maximum(h + b1_ref[...], 0.0)
    # fc2 on the MXU: cast activations to bf16, accumulate in f32.
    out = jnp.dot(h.astype(w2_ref.dtype), w2_ref[...],
                  preferred_element_type=jnp.float32)
    o_ref[...] = (out + b2_ref[...]).astype(o_ref.dtype)


def _round_up(x, m):
    return ((x + m - 1) // m) * m


def single_layer_nn_forward(x, w1, b1, w2, b2):
    """x: [B, C, H, W] float32.
    w1: [num_inputs, num_hiddens], b1: [1, num_hiddens],
    w2: [num_hiddens, num_outputs], b2: [1, num_outputs]."""
    B = x.shape[0]
    num_inputs, num_hiddens = w1.shape
    num_outputs = w2.shape[1]

    # ---- Flatten (glue, plain JAX): NCHW row-major == torch nn.Flatten ----
    x2d = x.reshape(B, num_inputs)

    # ---- Lane-dense padding of hidden / output dims (multiples of 128) ----
    Hp = _round_up(num_hiddens, 128)
    Np = _round_up(num_outputs, 128)

    # ---- Batch tiling: TM >= 128, pad B up to a multiple of TM ----
    TM = 256 if B >= 256 else 128
    B_pad = _round_up(B, TM)

    # bf16 matmul operands (cast once, in the wrapper). Biases stay f32.
    x_p = jnp.zeros((B_pad, num_inputs), jnp.bfloat16).at[:B, :].set(
        x2d.astype(jnp.bfloat16))
    w1_p = jnp.zeros((num_inputs, Hp), jnp.bfloat16).at[:, :num_hiddens].set(
        w1.astype(jnp.bfloat16))
    b1_p = jnp.zeros((1, Hp), jnp.float32).at[:, :num_hiddens].set(
        b1.astype(jnp.float32))
    w2_p = jnp.zeros((Hp, Np), jnp.bfloat16).at[:num_hiddens, :num_outputs].set(
        w2.astype(jnp.bfloat16))
    b2_p = jnp.zeros((1, Np), jnp.float32).at[:, :num_outputs].set(
        b2.astype(jnp.float32))

    # ---- VMEM budget: tiles (double-buffered) + resident weights ----
    # TODO(synk): for very large num_inputs add a K (reduction) grid axis with
    # a VMEM accumulator so w1 streams instead of living resident in VMEM.
    vmem_need = (
        2 * TM * num_inputs * 2          # x tile, 2 buffers, bf16
        + 2 * num_inputs * Hp * 2        # w1 (resident; budget 2 bufs)
        + 2 * Hp * 4                     # b1
        + 2 * Hp * Np * 2                # w2
        + 2 * Np * 4                     # b2
        + 2 * TM * Np * 4                # out tile, 2 buffers, f32
    )
    vmem_limit = int(min(max(2 * vmem_need + (4 << 20), 16 << 20), 48 << 20))

    cost = pl.CostEstimate(
        flops=2 * B_pad * (num_inputs * Hp + Hp * Np),
        transcendentals=0,
        bytes_accessed=(B_pad * num_inputs * 2 + num_inputs * Hp * 2
                        + Hp * 4 + Hp * Np * 2 + Np * 4 + B_pad * Np * 4),
    )

    grid = (pl.cdiv(B_pad, TM),)

    out_padded = pl.pallas_call(
        _mlp_kernel,
        out_shape=jax.ShapeDtypeStruct((B_pad, Np), jnp.float32),
        grid=grid,
        in_specs=[
            pl.BlockSpec((TM, num_inputs), lambda i: (i, 0)),   # x: tiled over batch
            pl.BlockSpec((num_inputs, Hp), lambda i: (0, 0)),   # w1: resident
            pl.BlockSpec((1, Hp), lambda i: (0, 0)),            # b1: resident
            pl.BlockSpec((Hp, Np), lambda i: (0, 0)),           # w2: resident
            pl.BlockSpec((1, Np), lambda i: (0, 0)),            # b2: resident
        ],
        out_specs=pl.BlockSpec((TM, Np), lambda i: (i, 0)),
        compiler_params=pltpu.CompilerParams(
            dimension_semantics=("parallel",),
            vmem_limit_bytes=vmem_limit,
        ),
        cost_estimate=cost,
    )(x_p, w1_p, b1_p, w2_p, b2_p)

    # Strip batch / lane padding.
    return out_padded[:B, :num_outputs]


def init_params(key, num_inputs, num_hiddens, num_outputs, dtype=jnp.float32):
    """Deterministic init mimicking PyTorch nn.Linear default:
    U(-1/sqrt(fan_in), 1/sqrt(fan_in)) for both weight and bias."""
    k1, k2, k3, k4 = jax.random.split(key, 4)
    bound1 = 1.0 / math.sqrt(num_inputs)
    bound2 = 1.0 / math.sqrt(num_hiddens)
    # Stored as [in, out] (transposed relative to PyTorch's [out, in]).
    w1 = jax.random.uniform(k1, (num_inputs, num_hiddens), dtype,
                            minval=-bound1, maxval=bound1)
    b1 = jax.random.uniform(k2, (1, num_hiddens), dtype,
                            minval=-bound1, maxval=bound1)
    w2 = jax.random.uniform(k3, (num_hiddens, num_outputs), dtype,
                            minval=-bound2, maxval=bound2)
    b2 = jax.random.uniform(k4, (1, num_outputs), dtype,
                            minval=-bound2, maxval=bound2)
    return w1, b1, w2, b2


if __name__ == "__main__":
    key = jax.random.PRNGKey(0)
    kx, kp = jax.random.split(key)

    # Small shapes consistent with the module: x [B, C, H, W] flattens to
    # num_inputs = C*H*W.
    B, C, H, W = 2, 4, 16, 16
    num_inputs = C * H * W          # 1024
    num_hiddens = 128
    num_outputs = 10

    x = jax.random.normal(kx, (B, C, H, W), dtype=jnp.float32)
    w1, b1, w2, b2 = init_params(kp, num_inputs, num_hiddens, num_outputs)

    out = single_layer_nn_forward(x, w1, b1, w2, b2)
    out = jax.block_until_ready(out)
    assert out.shape == (B, num_outputs)

    # Pure-JAX reference with the same bf16 rounding of matmul operands
    # (f32 accumulation), mirroring the kernel's numerics.
    x2d = x.reshape(B, num_inputs)
    xb = x2d.astype(jnp.bfloat16).astype(jnp.float32)
    w1b = w1.astype(jnp.bfloat16).astype(jnp.float32)
    w2b = w2.astype(jnp.bfloat16).astype(jnp.float32)
    h_ref = jnp.maximum(xb @ w1b + b1, 0.0)
    h_ref = h_ref.astype(jnp.bfloat16).astype(jnp.float32)
    ref = h_ref @ w2b + b2
    assert jnp.allclose(out, ref, atol=1e-2, rtol=1e-2), (
        jnp.max(jnp.abs(out - ref)))

    print("KERNEL_OK")
</pallas_src>

<mosaic_0001>
module attributes {stable_mosaic.version = 11 : i64} {
  func.func @_mlp_kernel(%arg0: i32, %arg1: memref<128x1024xbf16, #tpu.memory_space<vmem>>, %arg2: memref<1024x128xbf16, #tpu.memory_space<vmem>>, %arg3: memref<1x128xf32, #tpu.memory_space<vmem>>, %arg4: memref<128x128xbf16, #tpu.memory_space<vmem>>, %arg5: memref<1x128xf32, #tpu.memory_space<vmem>>, %arg6: memref<128x128xf32, #tpu.memory_space<vmem>>) attributes {dimension_semantics = [#tpu.dimension_semantics<parallel>], iteration_bounds = array<i64: 1>, scalar_prefetch = 0 : i64, scratch_operands = 0 : i64, tpu.core_type = #tpu.core_type<tc>, window_params = [{transform_indices = @transform_0, window_bounds = array<i64: 128, 1024>}, {pipeline_mode = #tpu.pipeline_mode<synchronous>, transform_indices = @transform_1, window_bounds = array<i64: 1024, 128>}, {pipeline_mode = #tpu.pipeline_mode<synchronous>, transform_indices = @transform_2, window_bounds = array<i64: 1, 128>}, {pipeline_mode = #tpu.pipeline_mode<synchronous>, transform_indices = @transform_3, window_bounds = array<i64: 128, 128>}, {pipeline_mode = #tpu.pipeline_mode<synchronous>, transform_indices = @transform_4, window_bounds = array<i64: 1, 128>}, {transform_indices = @transform_5, window_bounds = array<i64: 128, 128>}]} {
    %c0 = arith.constant 0 : index
    %c0_0 = arith.constant 0 : index
    %0 = vector.load %arg1[%c0, %c0_0] : memref<128x1024xbf16, #tpu.memory_space<vmem>>, vector<128x1024xbf16>
    %c0_1 = arith.constant 0 : index
    %c0_2 = arith.constant 0 : index
    %1 = vector.load %arg2[%c0_1, %c0_2] : memref<1024x128xbf16, #tpu.memory_space<vmem>>, vector<1024x128xbf16>
    %cst = arith.constant dense<0.000000e+00> : vector<128x128xf32>
    %2 = tpu.matmul %0, %1, %cst {dimension_numbers = #tpu.dot_dimension_numbers<[1], [0], [0], [1], [0, 0, 1, 1], [], []>} : vector<128x1024xbf16>, vector<1024x128xbf16>, vector<128x128xf32> -> vector<128x128xf32>
    %c0_3 = arith.constant 0 : index
    %c0_4 = arith.constant 0 : index
    %3 = vector.load %arg3[%c0_3, %c0_4] : memref<1x128xf32, #tpu.memory_space<vmem>>, vector<1x128xf32>
    %4 = vector.broadcast %3 : vector<1x128xf32> to vector<128x128xf32>
    %5 = arith.addf %2, %4 : vector<128x128xf32>
    %cst_5 = arith.constant 0.000000e+00 : f32
    %6 = vector.broadcast %cst_5 : f32 to vector<128x128xf32>
    %7 = arith.maximumf %5, %6 : vector<128x128xf32>
    %8 = arith.truncf %7 : vector<128x128xf32> to vector<128x128xbf16>
    %c0_6 = arith.constant 0 : index
    %c0_7 = arith.constant 0 : index
    %9 = vector.load %arg4[%c0_6, %c0_7] : memref<128x128xbf16, #tpu.memory_space<vmem>>, vector<128x128xbf16>
    %cst_8 = arith.constant dense<0.000000e+00> : vector<128x128xf32>
    %10 = tpu.matmul %8, %9, %cst_8 {dimension_numbers = #tpu.dot_dimension_numbers<[1], [0], [0], [1], [0, 0, 1, 1], [], []>} : vector<128x128xbf16>, vector<128x128xbf16>, vector<128x128xf32> -> vector<128x128xf32>
    %c0_9 = arith.constant 0 : index
    %c0_10 = arith.constant 0 : index
    %11 = vector.load %arg5[%c0_9, %c0_10] : memref<1x128xf32, #tpu.memory_space<vmem>>, vector<1x128xf32>
    %12 = vector.broadcast %11 : vector<1x128xf32> to vector<128x128xf32>
    %13 = arith.addf %10, %12 : vector<128x128xf32>
    %c0_11 = arith.constant 0 : index
    %c0_12 = arith.constant 0 : index
    %14 = vector.load %arg6[%c0_11, %c0_12] : memref<128x128xf32, #tpu.memory_space<vmem>>, vector<128x128xf32>
    tpu.vector_store %arg6[%c0_11, %c0_12], %13 {strides = array<i32>} : memref<128x128xf32, #tpu.memory_space<vmem>>, vector<128x128xf32>,
    return
  }
  func.func @transform_0(%arg0: i32) -> (i32, i32) {
    %c0_i32 = arith.constant 0 : i32
    %c0_i32_0 = arith.constant 0 : i32
    return %arg0, %c0_i32 : i32, i32
  }
  func.func @transform_1(%arg0: i32) -> (i32, i32) {
    %c0_i32 = arith.constant 0 : i32
    %c0_i32_0 = arith.constant 0 : i32
    %c0_i32_1 = arith.constant 0 : i32
    return %c0_i32, %c0_i32_0 : i32, i32
  }
  func.func @transform_2(%arg0: i32) -> (i32, i32) {
    %c0_i32 = arith.constant 0 : i32
    %c0_i32_0 = arith.constant 0 : i32
    %c0_i32_1 = arith.constant 0 : i32
    return %c0_i32, %c0_i32_0 : i32, i32
  }
  func.func @transform_3(%arg0: i32) -> (i32, i32) {
    %c0_i32 = arith.constant 0 : i32
    %c0_i32_0 = arith.constant 0 : i32
    %c0_i32_1 = arith.constant 0 : i32
    return %c0_i32, %c0_i32_0 : i32, i32
  }
  func.func @transform_4(%arg0: i32) -> (i32, i32) {
    %c0_i32 = arith.constant 0 : i32
    %c0_i32_0 = arith.constant 0 : i32
    %c0_i32_1 = arith.constant 0 : i32
    return %c0_i32, %c0_i32_0 : i32, i32
  }
  func.func @transform_5(%arg0: i32) -> (i32, i32) {
    %c0_i32 = arith.constant 0 : i32
    %c0_i32_0 = arith.constant 0 : i32
    return %arg0, %c0_i32 : i32, i32
  }
}

</mosaic_0001>

<bundles_post_ra>
// kernel: tpu_custom_call.1
= control target key start
LH: loop header
LB: loop body
LE: loop exit
PB: predicated region body
PF: predicated region fallthrough
CT: control target
= control target key end

     0   :  { %10 = vsyncpa [#allocation3], 0  ;;  %s2402_s0 = inlined_call_operand.hbm [shape: bf16[128,1024], index: 0, kind: input, shape index: {}]   ;;  %s2403_s1 = inlined_call_operand.hbm [shape: bf16[1024,128], index: 1, kind: input, shape index: {}]   ;;  %s2404_s2 = inlined_call_operand.vmem [shape: f32[1,128], index: 2, kind: input, shape index: {}]   ;;  %s2405_s3 = inlined_call_operand.hbm [shape: bf16[128,128], index: 3, kind: input, shape index: {}]   ;;  %s2406_s4 = inlined_call_operand.vmem [shape: f32[1,128], index: 4, kind: input, shape index: {}]   ;;  %s2407_s5 = inlined_call_operand.hbm [shape: f32[128,128], index: 5, kind: output, shape index: {}]  }
   0x1   :  { %11 = vsyncpa [#allocation6], 0 }
   0x2   :  { %12 = vsyncpa [#allocation4], 0  ;;  %s2206_s18 = smov [#allocation5]  }
   0x3   :  { %s30_s19 = sshll.u32 %s2206_s18, 4  ;;  %s31_s19 = int_to_ptr.vmem [resolvable:$true] %s30_s19 }
   0x4   :  { %s2128_s20 = scalar_lea.vmem %s31_s19, 8192  ;;  %p2133_p1 = scmp.lt.s32.totalorder %s31_s19, %s31_s19 }
   0x5   :  { %p2129_p0 = scmp.ne.s32.totalorder %s31_s19, %s2128_s20  ;;  %p2134_p2 = scmp.lt.s32.totalorder %s2128_s20, %s2128_s20 }
   0x7   :  { %p2135_p3 = por %p2134_p2, %p2133_p1 }
   0x9   :  { %p2136_p4 = pnand %p2135_p3, %p2129_p0 }
   0xb   :  { %2139 = shalt.err (!%p2136_p4)
}
   0xc   :  { %s2207_s21 = smov 64   ;;  %s2208_s22 = smov 4  }
   0xd   :  { %36 = dma.hbm_to_vmem [thread:$0]  %s2403_s1, 8192, %s31_s19, [#allocation6], %s2207_s21, %s2207_s21, %s2208_s22  }
   0xe   :  { %s2209_s25 = smov [#allocation2]  }
   0xf   :  { %s18_s26 = sshll.u32 %s2209_s25, 4  ;;  %s19_s26 = int_to_ptr.vmem [resolvable:$true] %s18_s26 }
  0x10   :  { %s2148_s27 = scalar_lea.vmem %s19_s26, 8192  ;;  %p2153_p6 = scmp.lt.s32.totalorder %s19_s26, %s19_s26 }
  0x11   :  { %p2149_p5 = scmp.ne.s32.totalorder %s19_s26, %s2148_s27  ;;  %p2154_p7 = scmp.lt.s32.totalorder %s2148_s27, %s2148_s27 }
  0x13   :  { %p2155_p8 = por %p2154_p7, %p2153_p6 }
  0x15   :  { %p2156_p9 = pnand %p2155_p8, %p2149_p5 }
  0x17   :  { %2159 = shalt.err (!%p2156_p9)
}
  0x18   :  { %s2210_s28 = smov 512   ;;  %s2211_s29 = smov 32  }
  0x19   :  { %24 = dma.hbm_to_vmem [thread:$0]  %s2402_s0, 8192, %s19_s26, [#allocation3], %s2210_s28, %s2210_s28, %s2211_s29  }
  0x1a   :  { %s2212_s7 = smov [#allocation7]  }
  0x1b   :  { %s44_s8 = sshll.u32 %s2212_s7, 4  ;;  %s45_s8 = int_to_ptr.vmem [resolvable:$true] %s44_s8 }
  0x1c   :  { %s2168_s1 = scalar_lea.vmem %s45_s8, 1024  ;;  %p2173_p11 = scmp.lt.s32.totalorder %s45_s8, %s45_s8 }
  0x1d   :  { %p2169_p10 = scmp.ne.s32.totalorder %s45_s8, %s2168_s1  ;;  %p2174_p12 = scmp.lt.s32.totalorder %s2168_s1, %s2168_s1 }
  0x1f   :  { %p2175_p13 = por %p2174_p12, %p2173_p11 }
  0x21   :  { %p2176_p0 = pnand %p2175_p13, %p2169_p10 }
  0x23   :  { %2179 = shalt.err (!%p2176_p0)
}
  0x24   :  { %50 = dma.hbm_to_vmem [thread:$0]  %s2405_s3, 1024, %s45_s8, [#allocation6], %s2207_s21, %s2207_s21, %s2208_s22  }
  0x25   :  { %2200 = dma.done.wait [#allocation3], 8192  }
  0x26   :  { %2201 = vsyncadd [#allocation3], 4294959104 }
  0x27   :  { %2202 = dma.done.wait [#allocation6], 9216  }
  0x28   :  { %2203 = vsyncadd [#allocation6], 4294958080  ;;  %v2048_v0 = vld [vmem:[#allocation5 + $0x78] sm:$0xff]   ;;  %v2052_v4 = vld [vmem:[#allocation5 + $0x70] sm:$0xff]  }
  0x29   :  { %v2049_v1 = vld [vmem:[#allocation5 + $0xf8] sm:$0xff]   ;;  %1718 = vmatprep.subr.bf16.mxu0 %v2048_v0  ;;  %v2053_v5 = vld [vmem:[#allocation5 + $0xf0] sm:$0xff]   ;;  %v2056_v8 = vld [vmem:[#allocation5 + $0x68] sm:$0xff]  }
  0x2a   :  { %v2050_v2 = vld [vmem:[#allocation5 + $0x38] sm:$0xff]   ;;  %1782 = vmatprep.subr.bf16.mxu1 %v2049_v1  ;;  %v2054_v6 = vld [vmem:[#allocation5 + $0x30] sm:$0xff]   ;;  %v2057_v9 = vld [vmem:[#allocation5 + $0xe8] sm:$0xff]  }
  0x2b   :  { %v2051_v3 = vld [vmem:[#allocation5 + $0xb8] sm:$0xff]   ;;  %1719 = vmatpush3.bf16.msra.mxu0 %v2050_v2  ;;  %v2055_v7 = vld [vmem:[#allocation5 + $0xb0] sm:$0xff]   ;;  %v2058_v10 = vld [vmem:[#allocation5 + $0x28] sm:$0xff]  }
  0x2c   :  { %1783 = vmatpush3.bf16.msra.mxu1 %v2051_v3  ;;  %1720 = vmatprep.subr.bf16.mxu0 %v2052_v4  ;;  %v2059_v11 = vld [vmem:[#allocation5 + $0xa8] sm:$0xff]   ;;  %v2060_v12 = vld [vmem:[#allocation5 + $0x60] sm:$0xff]   ;;  %v2064_v16 = vld [vmem:[#allocation5 + $0x58] sm:$0xff]  }
  0x2d   :  { %1784 = vmatprep.subr.bf16.mxu1 %v2053_v5  ;;  %v2061_v13 = vld [vmem:[#allocation5 + $0xe0] sm:$0xff]   ;;  %v2065_v17 = vld [vmem:[#allocation5 + $0xd8] sm:$0xff]   ;;  %v2068_v20 = vld [vmem:[#allocation5 + $0x50] sm:$0xff]  }
  0x2e   :  { %v2062_v14 = vld [vmem:[#allocation5 + $0x20] sm:$0xff]   ;;  %v2066_v18 = vld [vmem:[#allocation5 + $0x18] sm:$0xff]   ;;  %v2069_v21 = vld [vmem:[#allocation5 + $0xd0] sm:$0xff]  }
  0x2f   :  { %1721 = vmatpush3.bf16.msra.mxu0 %v2054_v6  ;;  %v2063_v15 = vld [vmem:[#allocation5 + $0xa0] sm:$0xff]   ;;  %v2067_v19 = vld [vmem:[#allocation5 + $0x98] sm:$0xff]   ;;  %v2070_v22 = vld [vmem:[#allocation5 + $0x10] sm:$0xff]  }
  0x30   :  { %1785 = vmatpush3.bf16.msra.mxu1 %v2055_v7  ;;  %1722 = vmatprep.subr.bf16.mxu0 %v2056_v8  ;;  %v2071_v23 = vld [vmem:[#allocation5 + $0x90] sm:$0xff]   ;;  %v2072_v24 = vld [vmem:[#allocation5 + $0x48] sm:$0xff]   ;;  %v2076_v28 = vld [vmem:[#allocation5 + $0x40] sm:$0xff]  }
  0x31   :  { %1786 = vmatprep.subr.bf16.mxu1 %v2057_v9  ;;  %v2073_v25 = vld [vmem:[#allocation5 + $0xc8] sm:$0xff]   ;;  %v2077_v29 = vld [vmem:[#allocation5 + $0xc0] sm:$0xff]   ;;  %v2080_v40 = vld [vmem:[#allocation5 + $0x178] sm:$0xff]  }
  0x32   :  { %v2074_v26 = vld [vmem:[#allocation5 + $0x8] sm:$0xff]   ;;  %v2078_v30 = vld [vmem:[#allocation5] sm:$0xff]   ;;  %v2081_v41 = vld [vmem:[#allocation5 + $0x138] sm:$0xff]  }
  0x33   :  { %1723 = vmatpush3.bf16.msra.mxu0 %v2058_v10  ;;  %v2075_v27 = vld [vmem:[#allocation5 + $0x88] sm:$0xff]   ;;  %v2079_v31 = vld [vmem:[#allocation5 + $0x80] sm:$0xff]   ;;  %v2082_v42 = vld [vmem:[#allocation5 + $0x1f8] sm:$0xff]  }
  0x34   :  { %1787 = vmatpush3.bf16.msra.mxu1 %v2059_v11  ;;  %1724 = vmatprep.subr.bf16.mxu0 %v2060_v12  ;;  %v63_v32 = vld [vmem:[#allocation2] sm:$0xff]  ;;  %v64_v34 = vld [vmem:[#allocation2 + $0x8] sm:$0xff]  ;;  %v2083_v43 = vld [vmem:[#allocation5 + $0x1b8] sm:$0xff]  }
  0x35   :  { %1788 = vmatprep.subr.bf16.mxu1 %v2061_v13  ;;  %v67_v33 = vld [vmem:[#allocation2 + $0x20] sm:$0xff]  ;;  %v68_v37 = vld [vmem:[#allocation2 + $0x28] sm:$0xff]  ;;  %v2084_v50 = vld [vmem:[#allocation5 + $0x170] sm:$0xff]  }
  0x36   :  { %v1581_v35 = vcombine.low %v63_v32, %v67_v33  ;;  %v1582_v36 = vcombine.high %v63_v32, %v67_v33  ;;  %v1583_v38 = vcombine.low %v64_v34, %v68_v37  ;;  %v1584_v39 = vcombine.high %v64_v34, %v68_v37  ;;  %v71_v44 = vld [vmem:[#allocation2 + $0x40] sm:$0xff]  ;;  %v72_v47 = vld [vmem:[#allocation2 + $0x48] sm:$0xff]  ;;  %v2085_v52 = vld [vmem:[#allocation5 + $0x130] sm:$0xff]  }
  0x37   :  { %1725 = vmatpush3.bf16.msra.mxu0 %v2062_v14  ;;  %v75_v45 = vld [vmem:[#allocation2 + $0x60] sm:$0xff]  ;;  %v76_v48 = vld [vmem:[#allocation2 + $0x68] sm:$0xff]  ;;  %v2086_v54 = vld [vmem:[#allocation5 + $0x1f0] sm:$0xff]  }
  0x38   :  { %1789 = vmatpush3.bf16.msra.mxu1 %v2063_v15  ;;  %1726 = vmatprep.subr.bf16.mxu0 %v2064_v16  ;;  %v1590_v46 = vcombine.high %v71_v44, %v75_v45  ;;  %v1592_v49 = vcombine.high %v72_v47, %v76_v48  ;;  %v1589_v51 = vcombine.low %v71_v44, %v75_v45  ;;  %v2087_v55 = vld [vmem:[#allocation5 + $0x1b0] sm:$0xff]   ;;  %v79_v56 = vld [vmem:[#allocation2 + $0x80] sm:$0xff]  ;;  %v80_v58 = vld [vmem:[#allocation2 + $0x88] sm:$0xff] }
  0x39   :  { %1790 = vmatprep.subr.bf16.mxu1 %v2065_v17  ;;  %998 = vmatprep.mubr.bf16.mxu0 %v1582_v36  ;;  %v1591_v53 = vcombine.low %v72_v47, %v76_v48  ;;  %v83_v57 = vld [vmem:[#allocation2 + $0xa0] sm:$0xff]  ;;  %v84_v59 = vld [vmem:[#allocation2 + $0xa8] sm:$0xff]  ;;  %v2102_v32 = vld [vmem:[#allocation5 + $0x1d0] sm:$0xff]  }
  0x3a   :  { %1095 = vmatprep.mubr.bf16.mxu1 %v1584_v39  ;;  %v1598_v60 = vcombine.high %v79_v56, %v83_v57  ;;  %v1600_v61 = vcombine.high %v80_v58, %v84_v59  ;;  %v2088_v62 = vld [vmem:[#allocation5 + $0x168] sm:$0xff]   ;;  %v1597_v2 = vcombine.low %v79_v56, %v83_v57  ;;  %v87_v3 = vld [vmem:[#allocation2 + $0xc0] sm:$0xff]  ;;  %v1599_v6 = vcombine.low %v80_v58, %v84_v59  ;;  %v2103_v33 = vld [vmem:[#allocation5 + $0x190] sm:$0xff]  }
  0x3b   :  { %1727 = vmatpush3.bf16.msra.mxu0 %v2066_v18  ;;  %v2089_v63 = vld [vmem:[#allocation5 + $0x128] sm:$0xff]   ;;  %v91_v4 = vld [vmem:[#allocation2 + $0xe0] sm:$0xff]  ;;  %v2096_v18 = vld [vmem:[#allocation5 + $0x158] sm:$0xff]  }
  0x3c   :  { %1791 = vmatpush3.bf16.msra.mxu1 %v2067_v19  ;;  %1728 = vmatprep.subr.bf16.mxu0 %v2068_v20  ;;  %v2090_v0 = vld [vmem:[#allocation5 + $0x1e8] sm:$0xff]   ;;  %v1606_v7 = vcombine.high %v87_v3, %v91_v4  ;;  %v2092_v10 = vld [vmem:[#allocation5 + $0x160] sm:$0xff]   ;;  %v1605_v19 = vcombine.low %v87_v3, %v91_v4  ;;  %v2097_v20 = vld [vmem:[#allocation5 + $0x118] sm:$0xff]  }
  0x3d   :  { %1792 = vmatprep.subr.bf16.mxu1 %v2069_v21  ;;  %v2091_v1 = vld [vmem:[#allocation5 + $0x1a8] sm:$0xff]   ;;  %v2093_v11 = vld [vmem:[#allocation5 + $0x120] sm:$0xff]  }
  0x3e   :  { %v88_v5 = vld [vmem:[#allocation2 + $0xc8] sm:$0xff]  ;;  %v2094_v12 = vld [vmem:[#allocation5 + $0x1e0] sm:$0xff]  }
  0x3f   :  { %1729 = vmatpush3.bf16.msra.mxu0 %v2070_v22  ;;  %v92_v8 = vld [vmem:[#allocation2 + $0xe8] sm:$0xff]  ;;  %v2095_v13 = vld [vmem:[#allocation5 + $0x1a0] sm:$0xff]  }
  0x40   :  { %1793 = vmatpush3.bf16.msra.mxu1 %v2071_v23  ;;  %1730 = vmatprep.subr.bf16.mxu0 %v2072_v24  ;;  %v1608_v9 = vcombine.high %v88_v5, %v92_v8  ;;  %v95_v14 = vld [vmem:[#allocation2 + $0x100] sm:$0xff]  ;;  %v96_v16 = vld [vmem:[#allocation2 + $0x108] sm:$0xff]  ;;  %v1607_v21 = vcombine.low %v88_v5, %v92_v8  ;;  %v2098_v23 = vld [vmem:[#allocation5 + $0x1d8] sm:$0xff]  }
  0x41   :  { %1794 = vmatprep.subr.bf16.mxu1 %v2073_v25  ;;  %v99_v15 = vld [vmem:[#allocation2 + $0x120] sm:$0xff]  ;;  %v100_v17 = vld [vmem:[#allocation2 + $0x128] sm:$0xff]  ;;  %v2099_v25 = vld [vmem:[#allocation5 + $0x198] sm:$0xff]  }
  0x42   :  { %v1614_v22 = vcombine.high %v95_v14, %v99_v15  ;;  %v1616_v24 = vcombine.high %v96_v16, %v100_v17  ;;  %v1613_v34 = vcombine.low %v95_v14, %v99_v15  ;;  %v2105_v39 = vld [vmem:[#allocation5 + $0x108] sm:$0xff]   ;;  %v2109_v48 = vld [vmem:[#allocation5 + $0x100] sm:$0xff]   ;;  %v74_v8 = vld [vmem:[#allocation2 + $0x58] sm:$0xff] }
  0x43   :  { %1731 = vmatpush3.bf16.msra.mxu0 %v2074_v26  ;;  %v103_v26 = vld [vmem:[#allocation2 + $0x140] sm:$0xff]  ;;  %v112_v44 = vld [vmem:[#allocation2 + $0x188] sm:$0xff]  ;;  %v81_v14 = vld [vmem:[#allocation2 + $0x90] sm:$0xff] }
  0x44   :  { %1795 = vmatpush3.bf16.msra.mxu1 %v2075_v27  ;;  %1732 = vmatprep.subr.bf16.mxu0 %v2076_v28  ;;  %v107_v27 = vld [vmem:[#allocation2 + $0x160] sm:$0xff]  ;;  %v2100_v28 = vld [vmem:[#allocation5 + $0x150] sm:$0xff]   ;;  %v116_v45 = vld [vmem:[#allocation2 + $0x1a8] sm:$0xff] }
  0x45   :  { %1796 = vmatprep.subr.bf16.mxu1 %v2077_v29  ;;  %v104_v29 = vld [vmem:[#allocation2 + $0x148] sm:$0xff]  ;;  %v1622_v36 = vcombine.high %v103_v26, %v107_v27  ;;  %v1621_v47 = vcombine.low %v103_v26, %v107_v27  ;;  %v1631_v59 = vcombine.low %v112_v44, %v116_v45  ;;  %v85_v15 = vld [vmem:[#allocation2 + $0xb0] sm:$0xff] }
  0x46   :  { %v120_v56 = vld [vmem:[#allocation2 + $0x1c8] sm:$0xff]  ;;  %v1601_v26 = vcombine.low %v81_v14, %v85_v15 }
  0x47   :  { %1733 = vmatpush3.bf16.msra.mxu0 %v2078_v30  ;;  %v108_v30 = vld [vmem:[#allocation2 + $0x168] sm:$0xff] }
  0x48   :  { %1797 = vmatpush3.bf16.msra.mxu1 %v2079_v31  ;;  %1846 = vmatprep.subr.bf16.mxu0 %v2080_v40  ;;  %v2101_v31 = vld [vmem:[#allocation5 + $0x110] sm:$0xff]   ;;  %v1624_v37 = vcombine.high %v104_v29, %v108_v30  ;;  %v2106_v40 = vld [vmem:[#allocation5 + $0x1c8] sm:$0xff]  }
  0x49   :  { %1910 = vmatprep.subr.bf16.mxu1 %v2082_v42  ;;  %v115_v42 = vld [vmem:[#allocation2 + $0x1a0] sm:$0xff]  ;;  %v124_v57 = vld [vmem:[#allocation2 + $0x1e8] sm:$0xff] }
  0x4a   :  { %999 = vmatmul.mubr.bf16.vlgmr.msra.gmra.mxu0 %v1581_v35  ;;  %v1615_v35 = vcombine.low %v96_v16, %v100_v17  ;;  %v1639_v3 = vcombine.low %v120_v56, %v124_v57  ;;  %v82_v16 = vld [vmem:[#allocation2 + $0x98] sm:$0xff] }
  0x4b   :  { %1096 = vmatmul.mubr.bf16.vlgmr.msra.gmra.mxu1 %v1583_v38  ;;  %1847 = vmatpush3.bf16.msra.mxu0 %v2081_v41  ;;  %v2104_v38 = vld [vmem:[#allocation5 + $0x148] sm:$0xff]   ;;  %v111_v41 = vld [vmem:[#allocation2 + $0x180] sm:$0xff]  ;;  %v86_v17 = vld [vmem:[#allocation2 + $0xb8] sm:$0xff] }
  0x4c   :  { %1911 = vmatpush3.bf16.msra.mxu1 %v2083_v43  ;;  %1006 = vmatprep.mubr.bf16.mxu0 %v1590_v46  ;;  %v2107_v43 = vld [vmem:[#allocation5 + $0x188] sm:$0xff]   ;;  %v2108_v46 = vld [vmem:[#allocation5 + $0x140] sm:$0xff]   ;;  %v1629_v58 = vcombine.low %v111_v41, %v115_v42  ;;  %v1603_v27 = vcombine.low %v82_v16, %v86_v17 }
  0x4d   :  { %1103 = vmatprep.mubr.bf16.mxu1 %v1592_v49  ;;  %1848 = vmatprep.subr.bf16.mxu0 %v2084_v50  ;;  %v1623_v49 = vcombine.low %v104_v29, %v108_v30  ;;  %v1630_v50 = vcombine.high %v111_v41, %v115_v42  ;;  %v97_v30 = vld [vmem:[#allocation2 + $0x110] sm:$0xff]  ;;  %v110_v41 = vld [vmem:[#allocation2 + $0x178] sm:$0xff] }
  0x4e   :  { %1912 = vmatprep.subr.bf16.mxu1 %v2086_v54  ;;  %v119_v54 = vld [vmem:[#allocation2 + $0x1c0] sm:$0xff] }
  0x4f   :  { %1849 = vmatpush3.bf16.msra.mxu0 %v2085_v52  ;;  %v1632_v52 = vcombine.high %v112_v44, %v116_v45 }
  0x50   :  { %1913 = vmatpush3.bf16.msra.mxu1 %v2087_v55  ;;  %1850 = vmatprep.subr.bf16.mxu0 %v2088_v62  ;;  %v123_v55 = vld [vmem:[#allocation2 + $0x1e0] sm:$0xff]  ;;  %v65_v62 = vld [vmem:[#allocation2 + $0x10] sm:$0xff] }
  0x51   :  { %1914 = vmatprep.subr.bf16.mxu1 %v2090_v0  ;;  %v66_v0 = vld [vmem:[#allocation2 + $0x18] sm:$0xff] }
  0x52   :  { %1007 = vmatmul.mubr.bf16.gmra.mxu0 %v1589_v51  ;;  %v2110_v51 = vld [vmem:[#allocation5 + $0x1c0] sm:$0xff]  }
  0x53   :  { %1104 = vmatmul.mubr.bf16.gmra.mxu1 %v1591_v53  ;;  %1014 = vmatprep.mubr.bf16.mxu0 %v1598_v60  ;;  %v2111_v53 = vld [vmem:[#allocation5 + $0x180] sm:$0xff]   ;;  %v1638_v60 = vcombine.high %v119_v54, %v123_v55 }
  0x54   :  { %1111 = vmatprep.mubr.bf16.mxu1 %v1600_v61  ;;  %1851 = vmatpush3.bf16.msra.mxu0 %v2089_v63  ;;  %v1640_v61 = vcombine.high %v120_v56, %v124_v57  ;;  %v69_v63 = vld [vmem:[#allocation2 + $0x30] sm:$0xff]  ;;  %v122_v56 = vld [vmem:[#allocation2 + $0x1d8] sm:$0xff] }
  0x55   :  { %1915 = vmatpush3.bf16.msra.mxu1 %v2091_v1  ;;  %1852 = vmatprep.subr.bf16.mxu0 %v2092_v10  ;;  %v70_v1 = vld [vmem:[#allocation2 + $0x38] sm:$0xff]  ;;  %v1586_v4 = vcombine.high %v65_v62, %v69_v63  ;;  %v1585_v10 = vcombine.low %v65_v62, %v69_v63 }
  0x56   :  { %1916 = vmatprep.subr.bf16.mxu1 %v2094_v12  ;;  %v1588_v5 = vcombine.high %v66_v0, %v70_v1  ;;  %v126_v57 = vld [vmem:[#allocation2 + $0x1f8] sm:$0xff] }
  0x57   :  { %v1643_v63 = vcombine.low %v122_v56, %v126_v57 }
  0x58   :  { %1853 = vmatpush3.bf16.msra.mxu0 %v2093_v11  ;;  %v1587_v11 = vcombine.low %v66_v0, %v70_v1  ;;  %v2112_v0 = vld [vmem:[#allocation7 + $0x38] sm:$0xff]   ;;  %v2113_v1 = vld [vmem:[#allocation7 + $0x30] sm:$0xff]  }
  0x59   :  { %1917 = vmatpush3.bf16.msra.mxu1 %v2095_v13  ;;  %1854 = vmatprep.subr.bf16.mxu0 %v2096_v18 }
  0x5a   :  { %1015 = vmatmul.mubr.bf16.gmra.mxu0 %v1597_v2  ;;  %1918 = vmatprep.subr.bf16.mxu1 %v2098_v23  ;;  %v1637_v2 = vcombine.low %v119_v54, %v123_v55  ;;  %v93_v23 = vld [vmem:[#allocation2 + $0xf0] sm:$0xff] }
  0x5b   :  { %1112 = vmatmul.mubr.bf16.gmra.mxu1 %v1599_v6  ;;  %1022 = vmatprep.mubr.bf16.mxu0 %v1606_v7  ;;  %v73_v6 = vld [vmem:[#allocation2 + $0x50] sm:$0xff] }
  0x5c   :  { %1119 = vmatprep.mubr.bf16.mxu1 %v1608_v9  ;;  %1855 = vmatpush3.bf16.msra.mxu0 %v2097_v20  ;;  %v77_v7 = vld [vmem:[#allocation2 + $0x70] sm:$0xff]  ;;  %v78_v9 = vld [vmem:[#allocation2 + $0x78] sm:$0xff]  ;;  %v1602_v20 = vcombine.high %v81_v14, %v85_v15 }
  0x5d   :  { %1919 = vmatpush3.bf16.msra.mxu1 %v2099_v25  ;;  %1856 = vmatprep.subr.bf16.mxu0 %v2100_v28  ;;  %v1594_v12 = vcombine.high %v73_v6, %v77_v7  ;;  %v1596_v13 = vcombine.high %v74_v8, %v78_v9  ;;  %v1593_v18 = vcombine.low %v73_v6, %v77_v7  ;;  %v94_v25 = vld [vmem:[#allocation2 + $0xf8] sm:$0xff]  ;;  %v121_v54 = vld [vmem:[#allocation2 + $0x1d0] sm:$0xff]  ;;  %v2118_v6 = vld [vmem:[#allocation7 + $0x8] sm:$0xff]  }
  0x5e   :  { %1920 = vmatprep.subr.bf16.mxu1 %v2102_v32  ;;  %v98_v32 = vld [vmem:[#allocation2 + $0x118] sm:$0xff]  ;;  %v125_v55 = vld [vmem:[#allocation2 + $0x1f0] sm:$0xff]  ;;  %v2119_v7 = vld [vmem:[#allocation7] sm:$0xff]  }
  0x5f   :  { %v1641_v62 = vcombine.low %v121_v54, %v125_v55 }
  0x60   :  { %1857 = vmatpush3.bf16.msra.mxu0 %v2101_v31  ;;  %v101_v31 = vld [vmem:[#allocation2 + $0x130] sm:$0xff] }
  0x61   :  { %1921 = vmatpush3.bf16.msra.mxu1 %v2103_v33  ;;  %1858 = vmatprep.subr.bf16.mxu0 %v2104_v38  ;;  %v102_v33 = vld [vmem:[#allocation2 + $0x138] sm:$0xff]  ;;  %v105_v38 = vld [vmem:[#allocation2 + $0x150] sm:$0xff]  ;;  %v1617_v42 = vcombine.low %v97_v30, %v101_v31 }
  0x62   :  { %1023 = vmatmul.mubr.bf16.gmra.mxu0 %v1605_v19  ;;  %1922 = vmatprep.subr.bf16.mxu1 %v2106_v40  ;;  %v1595_v19 = vcombine.low %v74_v8, %v78_v9  ;;  %v106_v40 = vld [vmem:[#allocation2 + $0x158] sm:$0xff] }
  0x63   :  { %1120 = vmatmul.mubr.bf16.gmra.mxu1 %v1607_v21  ;;  %1030 = vmatprep.mubr.bf16.mxu0 %v1614_v22  ;;  %v1604_v21 = vcombine.high %v82_v16, %v86_v17  ;;  %v89_v22 = vld [vmem:[#allocation2 + $0xd0] sm:$0xff]  ;;  %v1628_v45 = vcombine.high %v106_v40, %v110_v41 }
  0x64   :  { %1127 = vmatprep.mubr.bf16.mxu1 %v1616_v24  ;;  %1859 = vmatpush3.bf16.msra.mxu0 %v2105_v39  ;;  %v90_v24 = vld [vmem:[#allocation2 + $0xd8] sm:$0xff]  ;;  %v1610_v28 = vcombine.high %v89_v22, %v93_v23  ;;  %v109_v39 = vld [vmem:[#allocation2 + $0x170] sm:$0xff] }
  0x65   :  { %1923 = vmatpush3.bf16.msra.mxu1 %v2107_v43  ;;  %1860 = vmatprep.subr.bf16.mxu0 %v2108_v46  ;;  %v1612_v29 = vcombine.high %v90_v24, %v94_v25  ;;  %v1619_v43 = vcombine.low %v98_v32, %v102_v33  ;;  %v1626_v44 = vcombine.high %v105_v38, %v109_v39  ;;  %v113_v46 = vld [vmem:[#allocation2 + $0x190] sm:$0xff] }
  0x66   :  { %1924 = vmatprep.subr.bf16.mxu1 %v2110_v51  ;;  %v1627_v51 = vcombine.low %v106_v40, %v110_v41 }
  0x68   :  { %1861 = vmatpush3.bf16.msra.mxu0 %v2109_v48  ;;  %v114_v48 = vld [vmem:[#allocation2 + $0x198] sm:$0xff] }
  0x69   :  { %1925 = vmatpush3.bf16.msra.mxu1 %v2111_v53  ;;  %1990 = vmatprep.subr.bf16.mxu0 %v2112_v0 }
  0x6a   :  { %1031 = vmatmul.mubr.bf16.gmra.mxu0 %v1613_v34  ;;  %v1609_v34 = vcombine.low %v89_v22, %v93_v23  ;;  %2022 = vmatprep.subr.bf16.mxu1 %v2112_v0 }
  0x6b   :  { %1128 = vmatmul.mubr.bf16.gmra.mxu1 %v1615_v35  ;;  %1038 = vmatprep.mubr.bf16.mxu0 %v1622_v36  ;;  %v1611_v35 = vcombine.low %v90_v24, %v94_v25  ;;  %v1618_v36 = vcombine.high %v97_v30, %v101_v31 }
  0x6c   :  { %1135 = vmatprep.mubr.bf16.mxu1 %v1624_v37  ;;  %v1620_v37 = vcombine.high %v98_v32, %v102_v33 }
  0x72   :  { %1039 = vmatmul.mubr.bf16.gmra.mxu0 %v1621_v47  ;;  %v117_v47 = vld [vmem:[#allocation2 + $0x1b0] sm:$0xff] }
  0x73   :  { %1136 = vmatmul.mubr.bf16.gmra.mxu1 %v1623_v49  ;;  %1046 = vmatprep.mubr.bf16.mxu0 %v1630_v50  ;;  %v118_v49 = vld [vmem:[#allocation2 + $0x1b8] sm:$0xff]  ;;  %v1625_v50 = vcombine.low %v105_v38, %v109_v39 }
  0x74   :  { %1143 = vmatprep.mubr.bf16.mxu1 %v1632_v52  ;;  %v1634_v52 = vcombine.high %v113_v46, %v117_v47  ;;  %v1636_v53 = vcombine.high %v114_v48, %v118_v49 }
  0x7a   :  { %1047 = vmatmul.mubr.bf16.gmra.mxu0 %v1629_v58  ;;  %v1633_v58 = vcombine.low %v113_v46, %v117_v47 }
  0x7b   :  { %1144 = vmatmul.mubr.bf16.gmra.mxu1 %v1631_v59  ;;  %1054 = vmatprep.mubr.bf16.mxu0 %v1638_v60  ;;  %v1635_v59 = vcombine.low %v114_v48, %v118_v49  ;;  %v1642_v60 = vcombine.high %v121_v54, %v125_v55 }
  0x7c   :  { %1151 = vmatprep.mubr.bf16.mxu1 %v1640_v61  ;;  %v1644_v61 = vcombine.high %v122_v56, %v126_v57 }
  0x82   :  { %1055 = vmatmul.mubr.bf16.gmra.mxu0 %v1637_v2  ;;  %v2114_v2 = vld [vmem:[#allocation7 + $0x28] sm:$0xff]  }
  0x83   :  { %1152 = vmatmul.mubr.bf16.gmra.mxu1 %v1639_v3  ;;  %1192 = vmatprep.mubr.bf16.mxu0 %v1586_v4  ;;  %v2115_v3 = vld [vmem:[#allocation7 + $0x20] sm:$0xff]   ;;  %v2116_v4 = vld [vmem:[#allocation7 + $0x18] sm:$0xff]  }
  0x84   :  { %1289 = vmatprep.mubr.bf16.mxu1 %v1588_v5  ;;  %v2117_v5 = vld [vmem:[#allocation7 + $0x10] sm:$0xff]  }
  0x8a   :  { %1193 = vmatmul.mubr.bf16.vlgmr.msra.gmra.mxu0 %v1585_v10  ;;  %v2258_v10 = vld [vmem:[%s2404_s2] ss:$0 sm:$0xff] }
  0x8b   :  { %1290 = vmatmul.mubr.bf16.vlgmr.msra.gmra.mxu1 %v1587_v11  ;;  %1200 = vmatprep.mubr.bf16.mxu0 %v1594_v12 }
  0x8c   :  { %1297 = vmatprep.mubr.bf16.mxu1 %v1596_v13  ;;  %1991 = vmatpush3.bf16.msra.mxu0 %v2112_v0 }
  0x8d   :  { %2030 = vmatpush3.bf16.msra.mxu1 %v2112_v0  ;;  %1992 = vmatprep.subr.bf16.mxu0 %v2113_v1 }
  0x8e   :  { %2023 = vmatprep.subr.bf16.mxu1 %v2113_v1 }
  0x90   :  { %1993 = vmatpush3.bf16.msra.mxu0 %v2113_v1 }
  0x91   :  { %2031 = vmatpush3.bf16.msra.mxu1 %v2113_v1  ;;  %1994 = vmatprep.subr.bf16.mxu0 %v2114_v2 }
  0x92   :  { %1201 = vmatmul.mubr.bf16.gmra.mxu0 %v1593_v18  ;;  %2024 = vmatprep.subr.bf16.mxu1 %v2114_v2 }
  0x93   :  { %1298 = vmatmul.mubr.bf16.gmra.mxu1 %v1595_v19  ;;  %1208 = vmatprep.mubr.bf16.mxu0 %v1602_v20 }
  0x94   :  { %1305 = vmatprep.mubr.bf16.mxu1 %v1604_v21  ;;  %1995 = vmatpush3.bf16.msra.mxu0 %v2114_v2 }
  0x95   :  { %2032 = vmatpush3.bf16.msra.mxu1 %v2114_v2  ;;  %1996 = vmatprep.subr.bf16.mxu0 %v2115_v3 }
  0x96   :  { %2025 = vmatprep.subr.bf16.mxu1 %v2115_v3 }
  0x98   :  { %1997 = vmatpush3.bf16.msra.mxu0 %v2115_v3 }
  0x99   :  { %2033 = vmatpush3.bf16.msra.mxu1 %v2115_v3  ;;  %1998 = vmatprep.subr.bf16.mxu0 %v2116_v4 }
  0x9a   :  { %1209 = vmatmul.mubr.bf16.gmra.mxu0 %v1601_v26  ;;  %2026 = vmatprep.subr.bf16.mxu1 %v2116_v4 }
  0x9b   :  { %1306 = vmatmul.mubr.bf16.gmra.mxu1 %v1603_v27  ;;  %1216 = vmatprep.mubr.bf16.mxu0 %v1610_v28 }
  0x9c   :  { %1313 = vmatprep.mubr.bf16.mxu1 %v1612_v29  ;;  %1999 = vmatpush3.bf16.msra.mxu0 %v2116_v4 }
  0x9d   :  { %2034 = vmatpush3.bf16.msra.mxu1 %v2116_v4  ;;  %2000 = vmatprep.subr.bf16.mxu0 %v2117_v5 }
  0x9e   :  { %2027 = vmatprep.subr.bf16.mxu1 %v2117_v5 }
  0xa0   :  { %2001 = vmatpush3.bf16.msra.mxu0 %v2117_v5 }
  0xa1   :  { %2035 = vmatpush3.bf16.msra.mxu1 %v2117_v5  ;;  %2002 = vmatprep.subr.bf16.mxu0 %v2118_v6 }
  0xa2   :  { %1217 = vmatmul.mubr.bf16.gmra.mxu0 %v1609_v34  ;;  %2028 = vmatprep.subr.bf16.mxu1 %v2118_v6 }
  0xa3   :  { %1314 = vmatmul.mubr.bf16.gmra.mxu1 %v1611_v35  ;;  %1224 = vmatprep.mubr.bf16.mxu0 %v1618_v36 }
  0xa4   :  { %1321 = vmatprep.mubr.bf16.mxu1 %v1620_v37  ;;  %2003 = vmatpush3.bf16.msra.mxu0 %v2118_v6 }
  0xa5   :  { %2036 = vmatpush3.bf16.msra.mxu1 %v2118_v6  ;;  %2004 = vmatprep.subr.bf16.mxu0 %v2119_v7 }
  0xa6   :  { %2029 = vmatprep.subr.bf16.mxu1 %v2119_v7 }
  0xa8   :  { %2005 = vmatpush3.bf16.msra.mxu0 %v2119_v7 }
  0xa9   :  { %2037 = vmatpush3.bf16.msra.mxu1 %v2119_v7 }
  0xaa   :  { %1225 = vmatmul.mubr.bf16.gmra.mxu0 %v1617_v42 }
  0xab   :  { %1322 = vmatmul.mubr.bf16.gmra.mxu1 %v1619_v43  ;;  %1232 = vmatprep.mubr.bf16.mxu0 %v1626_v44 }
  0xac   :  { %1329 = vmatprep.mubr.bf16.mxu1 %v1628_v45 }
  0xb2   :  { %1233 = vmatmul.mubr.bf16.gmra.mxu0 %v1625_v50 }
  0xb3   :  { %1330 = vmatmul.mubr.bf16.gmra.mxu1 %v1627_v51  ;;  %1240 = vmatprep.mubr.bf16.mxu0 %v1634_v52 }
  0xb4   :  { %1337 = vmatprep.mubr.bf16.mxu1 %v1636_v53 }
  0xba   :  { %1241 = vmatmul.mubr.bf16.gmra.mxu0 %v1633_v58 }
  0xbb   :  { %1338 = vmatmul.mubr.bf16.gmra.mxu1 %v1635_v59  ;;  %1248 = vmatprep.mubr.bf16.mxu0 %v1642_v60 }
  0xbc   :  { %1345 = vmatprep.mubr.bf16.mxu1 %v1644_v61 }
  0xc2   :  { %1249 = vmatmul.mubr.bf16.gmra.mxu0 %v1641_v62 }
  0xc3   :  { %1346 = vmatmul.mubr.bf16.gmra.mxu1 %v1643_v63 }
 0x10a   :  { %v1734_v8 = vpop.f32.mrf.mxu0 }
 0x10b   :  { %v1798_v9 = vpop.f32.mrf.mxu1 }
 0x10c   :  { %v1735_v11 = vpop.f32.mrf.mxu0 }
 0x10d   :  { %v1736_v12 = vadd.f32 %v1735_v11, %v1734_v8  ;;  %v1799_v13 = vpop.f32.mrf.mxu1 }
 0x10e   :  { %v1800_v14 = vadd.f32 %v1799_v13, %v1798_v9  ;;  %v2260_v15 = vpop.f32.mrf.mxu0 }
 0x10f   :  { %v1001_v16 = vadd.f32 %v1736_v12, %v2258_v10  ;;  %v2263_v17 = vpop.f32.mrf.mxu1 }
 0x110   :  { %v2265_v18 = vpop.f32.mrf.mxu0 }
 0x111   :  { %v2267_v19 = vadd.f32 %v1800_v14, %v1001_v16  ;;  %v2269_v20 = vpop.f32.mrf.mxu1 }
 0x112   :  { %v1740_v21 = vpop.f32.mrf.mxu0 }
 0x113   :  { %v1804_v22 = vpop.f32.mrf.mxu1 }
 0x114   :  { %v1741_v23 = vpop.f32.mrf.mxu0 }
 0x115   :  { %v1742_v24 = vadd.f32 %v1741_v23, %v1740_v21  ;;  %v1805_v25 = vpop.f32.mrf.mxu1 }
 0x116   :  { %v1806_v26 = vadd.f32 %v1805_v25, %v1804_v22  ;;  %v2271_v27 = vpop.f32.mrf.mxu0 }
 0x117   :  { %v1009_v28 = vadd.f32 %v1742_v24, %v2258_v10  ;;  %v2274_v29 = vpop.f32.mrf.mxu1 }
 0x118   :  { %v2276_v30 = vpop.f32.mrf.mxu0 }
 0x119   :  { %v2278_v31 = vadd.f32 %v1806_v26, %v1009_v28  ;;  %v2280_v32 = vpop.f32.mrf.mxu1 }
 0x11a   :  { %v1746_v33 = vpop.f32.mrf.mxu0 }
 0x11b   :  { %v1810_v34 = vpop.f32.mrf.mxu1 }
 0x11c   :  { %v1747_v35 = vpop.f32.mrf.mxu0 }
 0x11d   :  { %v1748_v36 = vadd.f32 %v1747_v35, %v1746_v33  ;;  %v1811_v37 = vpop.f32.mrf.mxu1 }
 0x11e   :  { %v1812_v38 = vadd.f32 %v1811_v37, %v1810_v34  ;;  %v2282_v39 = vpop.f32.mrf.mxu0 }
 0x11f   :  { %v1017_v40 = vadd.f32 %v1748_v36, %v2258_v10  ;;  %v2285_v41 = vpop.f32.mrf.mxu1 }
 0x120   :  { %v2287_v42 = vpop.f32.mrf.mxu0 }
 0x121   :  { %v2289_v43 = vadd.f32 %v1812_v38, %v1017_v40  ;;  %v2291_v44 = vpop.f32.mrf.mxu1 }
 0x122   :  { %v1752_v45 = vpop.f32.mrf.mxu0 }
 0x123   :  { %v1816_v46 = vpop.f32.mrf.mxu1 }
 0x124   :  { %v1753_v47 = vpop.f32.mrf.mxu0 }
 0x125   :  { %v1754_v48 = vadd.f32 %v1753_v47, %v1752_v45  ;;  %v1817_v49 = vpop.f32.mrf.mxu1 }
 0x126   :  { %v1818_v50 = vadd.f32 %v1817_v49, %v1816_v46  ;;  %v2293_v51 = vpop.f32.mrf.mxu0 }
 0x127   :  { %v1025_v52 = vadd.f32 %v1754_v48, %v2258_v10  ;;  %v2296_v53 = vpop.f32.mrf.mxu1 }
 0x128   :  { %v2298_v54 = vpop.f32.mrf.mxu0 }
 0x129   :  { %v2300_v55 = vadd.f32 %v1818_v50, %v1025_v52  ;;  %v2302_v56 = vpop.f32.mrf.mxu1 }
 0x12a   :  { %v1758_v57 = vpop.f32.mrf.mxu0 }
 0x12b   :  { %v1822_v58 = vpop.f32.mrf.mxu1 }
 0x12c   :  { %v1759_v59 = vpop.f32.mrf.mxu0 }
 0x12d   :  { %v1760_v60 = vadd.f32 %v1759_v59, %v1758_v57  ;;  %v1823_v61 = vpop.f32.mrf.mxu1 }
 0x12e   :  { %v1824_v62 = vadd.f32 %v1823_v61, %v1822_v58  ;;  %v2304_v63 = vpop.f32.mrf.mxu0 }
 0x12f   :  { %v1033_v0 = vadd.f32 %v1760_v60, %v2258_v10  ;;  %v2307_v1 = vpop.f32.mrf.mxu1  ;;  %v1739_v60 = vadd.f32 %v2265_v18, %v2260_v15  ;;  %v1745_v18 = vadd.f32 %v2276_v30, %v2271_v27 }
 0x130   :  { %v2309_v2 = vpop.f32.mrf.mxu0 }
 0x131   :  { %v2311_v3 = vadd.f32 %v1824_v62, %v1033_v0  ;;  %v2313_v4 = vpop.f32.mrf.mxu1 }
 0x132   :  { %v1764_v5 = vpop.f32.mrf.mxu0 }
 0x133   :  { %v1828_v6 = vpop.f32.mrf.mxu1 }
 0x134   :  { %v1765_v7 = vpop.f32.mrf.mxu0 }
 0x135   :  { %v1766_v8 = vadd.f32 %v1765_v7, %v1764_v5  ;;  %v1829_v9 = vpop.f32.mrf.mxu1  ;;  %v1004_v7 = vadd.f32 %v1739_v60, %v2258_v10  ;;  %v1809_v60 = vadd.f32 %v2280_v32, %v2274_v29 }
 0x136   :  { %v1830_v11 = vadd.f32 %v1829_v9, %v1828_v6  ;;  %v2315_v12 = vpop.f32.mrf.mxu0 }
 0x137   :  { %v1041_v13 = vadd.f32 %v1766_v8, %v2258_v10  ;;  %v2318_v14 = vpop.f32.mrf.mxu1 }
 0x138   :  { %v2320_v16 = vpop.f32.mrf.mxu0 }
 0x139   :  { %v2322_v21 = vadd.f32 %v1830_v11, %v1041_v13  ;;  %v2324_v22 = vpop.f32.mrf.mxu1  ;;  %v1803_v13 = vadd.f32 %v2269_v20, %v2263_v17 }
 0x13a   :  { %v1770_v23 = vpop.f32.mrf.mxu0 }
 0x13b   :  { %v1834_v24 = vpop.f32.mrf.mxu1  ;;  %v1101_v15 = vadd.f32 %v1803_v13, %v1004_v7 }
 0x13c   :  { %v1771_v25 = vpop.f32.mrf.mxu0 }
 0x13d   :  { %v1772_v26 = vadd.f32 %v1771_v25, %v1770_v23  ;;  %v1835_v28 = vpop.f32.mrf.mxu1 }
 0x13e   :  { %v1836_v33 = vadd.f32 %v1835_v28, %v1834_v24  ;;  %v2326_v34 = vpop.f32.mrf.mxu0 }
 0x13f   :  { %v1049_v35 = vadd.f32 %v1772_v26, %v2258_v10  ;;  %v2329_v36 = vpop.f32.mrf.mxu1 }
 0x140   :  { %v2331_v37 = vpop.f32.mrf.mxu0 }
 0x141   :  { %v2333_v38 = vadd.f32 %v1836_v33, %v1049_v35  ;;  %v2335_v40 = vpop.f32.mrf.mxu1 }
 0x142   :  { %v1776_v45 = vpop.f32.mrf.mxu0 }
 0x143   :  { %v1840_v46 = vpop.f32.mrf.mxu1 }
 0x144   :  { %v1777_v47 = vpop.f32.mrf.mxu0 }
 0x145   :  { %v1778_v48 = vadd.f32 %v1777_v47, %v1776_v45  ;;  %v1841_v49 = vpop.f32.mrf.mxu1 }
 0x146   :  { %v1842_v50 = vadd.f32 %v1841_v49, %v1840_v46  ;;  %v2337_v52 = vpop.f32.mrf.mxu0 }
 0x147   :  { %v1057_v57 = vadd.f32 %v1778_v48, %v2258_v10  ;;  %v2340_v58 = vpop.f32.mrf.mxu1 }
 0x148   :  { %v2342_v59 = vpop.f32.mrf.mxu0 }
 0x149   :  { %v2346_v61 = vadd.f32 %v1842_v50, %v1057_v57  ;;  %v2348_v62 = vpop.f32.mrf.mxu1  ;;  %v1012_v50 = vadd.f32 %v1745_v18, %v2258_v10 }
 0x14a   :  { %v1862_v0 = vpop.f32.mrf.mxu0 }
 0x14b   :  { %v1926_v5 = vpop.f32.mrf.mxu1 }
 0x14c   :  { %v1863_v6 = vpop.f32.mrf.mxu0 }
 0x14d   :  { %v1864_v8 = vadd.f32 %v1863_v6, %v1862_v0  ;;  %v1927_v9 = vpop.f32.mrf.mxu1  ;;  %v1751_v6 = vadd.f32 %v2287_v42, %v2282_v39  ;;  %v1815_v39 = vadd.f32 %v2291_v44, %v2285_v41 }
 0x14e   :  { %v1865_v11 = vpop.f32.mrf.mxu0  ;;  %v1928_v26 = vadd.f32 %v1927_v9, %v1926_v5 }
 0x14f   :  { %v1195_v23 = vadd.f32 %v1864_v8, %v2267_v19  ;;  %v1929_v24 = vpop.f32.mrf.mxu1  ;;  %v1109_v8 = vadd.f32 %v1809_v60, %v1012_v50  ;;  %v1020_v29 = vadd.f32 %v1751_v6, %v2258_v10  ;;  %v1757_v50 = vadd.f32 %v2298_v54, %v2293_v51 }
 0x150   :  { %v1866_v25 = vpop.f32.mrf.mxu0  ;;  %v1821_v51 = vadd.f32 %v2302_v56, %v2296_v53 }
 0x151   :  { %v1867_v28 = vadd.f32 %v1866_v25, %v1865_v11  ;;  %v1930_v33 = vpop.f32.mrf.mxu1  ;;  %v1292_v45 = vadd.f32 %v1928_v26, %v1195_v23 }
 0x152   :  { %v1868_v35 = vpop.f32.mrf.mxu0  ;;  %v1931_v47 = vadd.f32 %v1930_v33, %v1929_v24 }
 0x153   :  { %v1198_v46 = vadd.f32 %v1867_v28, %v1101_v15  ;;  %v1932_v48 = vpop.f32.mrf.mxu1  ;;  %v1354_v0 = vmax.f32 %v1292_v45, 0.0 }
 0x154   :  { %v1869_v49 = vpop.f32.mrf.mxu0 }
 0x155   :  { %v1295_v17 = vadd.f32 %v1931_v47, %v1198_v46  ;;  %v1870_v20 = vadd.f32 %v1869_v49, %v1868_v35  ;;  %v1933_v19 = vpop.f32.mrf.mxu1 }
 0x156   :  { %v1871_v57 = vpop.f32.mrf.mxu0  ;;  %v1934_v9 = vadd.f32 %v1933_v19, %v1932_v48  ;;  %v1117_v48 = vadd.f32 %v1815_v39, %v1020_v29 }
 0x157   :  { %v1355_v27 = vmax.f32 %v1295_v17, 0.0  ;;  %v1203_v30 = vadd.f32 %v1870_v20, %v2278_v31  ;;  %v1935_v5 = vpop.f32.mrf.mxu1 }
 0x158   :  { %v1872_v7 = vpop.f32.mrf.mxu0 }
 0x159   :  { %v1873_v11 = vadd.f32 %v1872_v7, %v1871_v57  ;;  %v1936_v13 = vpop.f32.mrf.mxu1  ;;  %v1370_v23 = vpack.c.bf16 %v1355_v27, %v1354_v0  ;;  %v1300_v25 = vadd.f32 %v1934_v9, %v1203_v30 }
 0x15a   :  { %v1874_v24 = vpop.f32.mrf.mxu0  ;;  %v1937_v18 = vadd.f32 %v1936_v13, %v1935_v5  ;;  %v1028_v5 = vadd.f32 %v1757_v50, %v2258_v10 }
 0x15b   :  { %v1206_v15 = vadd.f32 %v1873_v11, %v1109_v8  ;;  %v1938_v26 = vpop.f32.mrf.mxu1  ;;  %2006 = vmatprep.mubr.bf16.mxu0 %v1370_v23  ;;  %v1356_v35 = vmax.f32 %v1300_v25, 0.0  ;;  %v1763_v23 = vadd.f32 %v2309_v2, %v2304_v63  ;;  %v1827_v63 = vadd.f32 %v2313_v4, %v2307_v1 }
 0x15c   :  { %v1875_v32 = vpop.f32.mrf.mxu0  ;;  %v1125_v25 = vadd.f32 %v1821_v51, %v1028_v5 }
 0x15d   :  { %v1303_v31 = vadd.f32 %v1937_v18, %v1206_v15  ;;  %v1876_v28 = vadd.f32 %v1875_v32, %v1874_v24  ;;  %v1939_v33 = vpop.f32.mrf.mxu1  ;;  %v1036_v53 = vadd.f32 %v1763_v23, %v2258_v10 }
 0x15e   :  { %v1877_v42 = vpop.f32.mrf.mxu0  ;;  %v1940_v20 = vadd.f32 %v1939_v33, %v1938_v26 }
 0x15f   :  { %v1357_v45 = vmax.f32 %v1303_v31, 0.0  ;;  %v1211_v46 = vadd.f32 %v1876_v28, %v2289_v43  ;;  %v1941_v47 = vpop.f32.mrf.mxu1 }
 0x160   :  { %v1878_v49 = vpop.f32.mrf.mxu0 }
 0x161   :  { %v1371_v17 = vpack.c.bf16 %v1357_v45, %v1356_v35  ;;  %v1879_v19 = vadd.f32 %v1878_v49, %v1877_v42  ;;  %v1942_v57 = vpop.f32.mrf.mxu1  ;;  %v1308_v0 = vadd.f32 %v1940_v20, %v1211_v46  ;;  %v1133_v49 = vadd.f32 %v1827_v63, %v1036_v53 }
 0x162   :  { %v1880_v60 = vpop.f32.mrf.mxu0  ;;  %v1943_v30 = vadd.f32 %v1942_v57, %v1941_v47 }
 0x163   :  { %v1214_v27 = vadd.f32 %v1879_v19, %v1117_v48  ;;  %v1944_v41 = vpop.f32.mrf.mxu1  ;;  %2007 = vmatmul.mubr.bf16.vlgmr.msra.gmra.mxu0 %v1371_v17  ;;  %v1358_v54 = vmax.f32 %v1308_v0, 0.0  ;;  %v1769_v17 = vadd.f32 %v2320_v16, %v2315_v12  ;;  %v1833_v12 = vadd.f32 %v2324_v22, %v2318_v14 }
 0x164   :  { %v1881_v44 = vpop.f32.mrf.mxu0 }
 0x165   :  { %v1311_v43 = vadd.f32 %v1943_v30, %v1214_v27  ;;  %v1882_v6 = vadd.f32 %v1881_v44, %v1880_v60  ;;  %v1945_v7 = vpop.f32.mrf.mxu1  ;;  %v1044_v44 = vadd.f32 %v1769_v17, %v2258_v10 }
 0x166   :  { %v1883_v8 = vpop.f32.mrf.mxu0  ;;  %v1946_v15 = vadd.f32 %v1945_v7, %v1944_v41 }
 0x167   :  { %v1359_v9 = vmax.f32 %v1311_v43, 0.0  ;;  %v1219_v11 = vadd.f32 %v1882_v6, %v2300_v55  ;;  %v1947_v13 = vpop.f32.mrf.mxu1 }
 0x168   :  { %v1884_v24 = vpop.f32.mrf.mxu0 }
 0x169   :  { %v1885_v18 = vadd.f32 %v1884_v24, %v1883_v8  ;;  %v1948_v26 = vpop.f32.mrf.mxu1  ;;  %v1372_v29 = vpack.c.bf16 %v1359_v9, %v1358_v54  ;;  %v1316_v31 = vadd.f32 %v1946_v15, %v1219_v11  ;;  %v1775_v54 = vadd.f32 %v2331_v37, %v2326_v34 }
 0x16a   :  { %v1886_v32 = vpop.f32.mrf.mxu0  ;;  %v1949_v33 = vadd.f32 %v1948_v26, %v1947_v13  ;;  %v1141_v11 = vadd.f32 %v1833_v12, %v1044_v44  ;;  %v1839_v34 = vadd.f32 %v2335_v40, %v2329_v36 }
 0x16b   :  { %v1222_v28 = vadd.f32 %v1885_v18, %v1125_v25  ;;  %v1950_v39 = vpop.f32.mrf.mxu1  ;;  %2010 = vmatprep.mubr.bf16.mxu0 %v1372_v29  ;;  %v1360_v45 = vmax.f32 %v1316_v31, 0.0  ;;  %v1052_v14 = vadd.f32 %v1775_v54, %v2258_v10 }
 0x16c   :  { %v1887_v56 = vpop.f32.mrf.mxu0 }
 0x16d   :  { %v1319_v55 = vadd.f32 %v1949_v33, %v1222_v28  ;;  %v1888_v42 = vadd.f32 %v1887_v56, %v1886_v32  ;;  %v1951_v35 = vpop.f32.mrf.mxu1 }
 0x16e   :  { %v1889_v2 = vpop.f32.mrf.mxu0  ;;  %v1952_v20 = vadd.f32 %v1951_v35, %v1950_v39  ;;  %v1781_v35 = vadd.f32 %v2342_v59, %v2337_v52  ;;  %v1845_v52 = vadd.f32 %v2348_v62, %v2340_v58  ;;  %v1709_v58 = vld [vmem:[%s2406_s4] ss:$0 sm:$0xff]  ;;  %s2213_s4 = smov [#allocation8]  }
 0x16f   :  { %v1361_v46 = vmax.f32 %v1319_v55, 0.0  ;;  %v1227_v47 = vadd.f32 %v1888_v42, %v2311_v3  ;;  %v1953_v48 = vpop.f32.mrf.mxu1  ;;  %v1149_v55 = vadd.f32 %v1839_v34, %v1052_v14  ;;  %s1567_s12 = sshll.u32 %s2213_s4, 4  ;;  %s1568_s12 = int_to_ptr.vmem [resolvable:$true] %s1567_s12 }
 0x170   :  { %v1890_v50 = vpop.f32.mrf.mxu0  ;;  %v1060_v17 = vadd.f32 %v1781_v35, %v2258_v10  ;;  %s2180_s13 = scalar_lea.vmem %s1568_s12, 2048  ;;  %p2185_p2 = scmp.lt.s32.totalorder %s1568_s12, %s1568_s12 }
 0x171   :  { %v1891_v19 = vadd.f32 %v1890_v50, %v1889_v2  ;;  %v1954_v57 = vpop.f32.mrf.mxu1  ;;  %v1373_v60 = vpack.c.bf16 %v1361_v46, %v1360_v45  ;;  %v1324_v27 = vadd.f32 %v1952_v20, %v1227_v47  ;;  %p2181_p1 = scmp.ne.s32.totalorder %s1568_s12, %s2180_s13  ;;  %p2186_p3 = scmp.lt.s32.totalorder %s2180_s13, %s2180_s13 }
 0x172   :  { %v1892_v0 = vpop.f32.mrf.mxu0  ;;  %v1955_v41 = vadd.f32 %v1954_v57, %v1953_v48 }
 0x173   :  { %v1230_v30 = vadd.f32 %v1891_v19, %v1133_v49  ;;  %v1956_v1 = vpop.f32.mrf.mxu1  ;;  %2011 = vmatmul.mubr.bf16.gmra.mxu0 %v1373_v60  ;;  %v1362_v16 = vmax.f32 %v1324_v27, 0.0  ;;  %p2187_p4 = por %p2186_p3, %p2185_p2 }
 0x174   :  { %v1893_v4 = vpop.f32.mrf.mxu0 }
 0x175   :  { %v1327_v3 = vadd.f32 %v1955_v41, %v1230_v30  ;;  %v1894_v5 = vadd.f32 %v1893_v4, %v1892_v0  ;;  %v1957_v43 = vpop.f32.mrf.mxu1  ;;  %v1157_v41 = vadd.f32 %v1845_v52, %v1060_v17  ;;  %p2188_p5 = pnand %p2187_p4, %p2181_p1 }
 0x176   :  { %v1895_v6 = vpop.f32.mrf.mxu0  ;;  %v1958_v13 = vadd.f32 %v1957_v43, %v1956_v1 }
 0x177   :  { %v1363_v7 = vmax.f32 %v1327_v3, 0.0  ;;  %v1235_v8 = vadd.f32 %v1894_v5, %v2322_v21  ;;  %v1959_v51 = vpop.f32.mrf.mxu1 }
 0x178   :  { %v1896_v9 = vpop.f32.mrf.mxu0 }
 0x179   :  { %v1897_v23 = vadd.f32 %v1896_v9, %v1895_v6  ;;  %v1960_v24 = vpop.f32.mrf.mxu1  ;;  %v1374_v25 = vpack.c.bf16 %v1363_v7, %v1362_v16  ;;  %v1332_v18 = vadd.f32 %v1958_v13, %v1235_v8 }
 0x17a   :  { %v1898_v15 = vpop.f32.mrf.mxu0  ;;  %v1961_v29 = vadd.f32 %v1960_v24, %v1959_v51 }
 0x17b   :  { %v1238_v26 = vadd.f32 %v1897_v23, %v1141_v11  ;;  %v1962_v32 = vpop.f32.mrf.mxu1  ;;  %2014 = vmatprep.mubr.bf16.mxu1 %v1374_v25  ;;  %v1364_v33 = vmax.f32 %v1332_v18, 0.0 }
 0x17c   :  { %v1899_v22 = vpop.f32.mrf.mxu0 }
 0x17d   :  { %v1335_v21 = vadd.f32 %v1961_v29, %v1238_v26  ;;  %v1900_v31 = vadd.f32 %v1899_v22, %v1898_v15  ;;  %v1963_v28 = vpop.f32.mrf.mxu1 }
 0x17e   :  { %v1901_v37 = vpop.f32.mrf.mxu0  ;;  %v1964_v2 = vadd.f32 %v1963_v28, %v1962_v32 }
 0x17f   :  { %v1365_v39 = vmax.f32 %v1335_v21, 0.0  ;;  %v1243_v53 = vadd.f32 %v1900_v31, %v2333_v38  ;;  %v1965_v56 = vpop.f32.mrf.mxu1 }
 0x180   :  { %v1902_v42 = vpop.f32.mrf.mxu0 }
 0x181   :  { %v1375_v63 = vpack.c.bf16 %v1365_v39, %v1364_v33  ;;  %v1903_v45 = vadd.f32 %v1902_v42, %v1901_v37  ;;  %v1966_v46 = vpop.f32.mrf.mxu1  ;;  %v1340_v48 = vadd.f32 %v1964_v2, %v1243_v53 }
 0x182   :  { %v1904_v47 = vpop.f32.mrf.mxu0  ;;  %v1967_v50 = vadd.f32 %v1966_v46, %v1965_v56 }
 0x183   :  { %v1246_v49 = vadd.f32 %v1903_v45, %v1149_v55  ;;  %v1968_v36 = vpop.f32.mrf.mxu1  ;;  %2015 = vmatmul.mubr.bf16.vlgmr.msra.gmra.mxu1 %v1375_v63  ;;  %v1366_v59 = vmax.f32 %v1340_v48, 0.0 }
 0x184   :  { %v1905_v40 = vpop.f32.mrf.mxu0 }
 0x185   :  { %v1343_v38 = vadd.f32 %v1967_v50, %v1246_v49  ;;  %v1906_v20 = vadd.f32 %v1905_v40, %v1904_v47  ;;  %v1969_v19 = vpop.f32.mrf.mxu1 }
 0x186   :  { %v1907_v57 = vpop.f32.mrf.mxu0  ;;  %v1970_v1 = vadd.f32 %v1969_v19, %v1968_v36 }
 0x187   :  { %v1367_v60 = vmax.f32 %v1343_v38, 0.0  ;;  %v1251_v0 = vadd.f32 %v1906_v20, %v2346_v61  ;;  %v1971_v27 = vpop.f32.mrf.mxu1 }
 0x188   :  { %v1908_v30 = vpop.f32.mrf.mxu0 }
 0x189   :  { %v1909_v4 = vadd.f32 %v1908_v30, %v1907_v57  ;;  %v1972_v44 = vpop.f32.mrf.mxu1  ;;  %v1376_v3 = vpack.c.bf16 %v1367_v60, %v1366_v59  ;;  %v1348_v5 = vadd.f32 %v1970_v1, %v1251_v0 }
 0x18a   :  { %v1973_v43 = vadd.f32 %v1972_v44, %v1971_v27 }
 0x18b   :  { %v1254_v10 = vadd.f32 %v1909_v4, %v1157_v41  ;;  %2018 = vmatprep.mubr.bf16.mxu1 %v1376_v3  ;;  %v1368_v12 = vmax.f32 %v1348_v5, 0.0 }
 0x18d   :  { %v1351_v6 = vadd.f32 %v1973_v43, %v1254_v10 }
 0x18f   :  { %v1369_v16 = vmax.f32 %v1351_v6, 0.0 }
 0x191   :  { %v1377_v7 = vpack.c.bf16 %v1369_v16, %v1368_v12 }
 0x193   :  { %2019 = vmatmul.mubr.bf16.gmra.mxu1 %v1377_v7 }
 0x223   :  { %v2008_v61 = vpop.f32.mrf.mxu0 }
 0x224   :  { %v1492_v62 = vadd.f32 %v2008_v61, %v1709_v58 }
 0x225   :  { %v1483_v8 = vpop.f32.mrf.mxu0 }
 0x226   :  { %1548 = vst [vmem:[#allocation8 + $0x10] sm:$0xff] %v1492_v62  ;;  %v1484_v51 = vadd.f32 %v1709_v58, %v1483_v8 }
 0x227   :  { %v2009_v54 = vpop.f32.mrf.mxu0 }
 0x228   :  { %1546 = vst [vmem:[#allocation8] sm:$0xff] %v1484_v51  ;;  %v1495_v9 = vadd.f32 %v2009_v54, %v1709_v58 }
 0x229   :  { %v1486_v11 = vpop.f32.mrf.mxu0 }
 0x22a   :  { %1549 = vst [vmem:[#allocation8 + $0x18] sm:$0xff] %v1495_v9  ;;  %v1487_v13 = vadd.f32 %v1709_v58, %v1486_v11 }
 0x22c   :  { %1547 = vst [vmem:[#allocation8 + $0x8] sm:$0xff] %v1487_v13 }
 0x233   :  { %v2012_v23 = vpop.f32.mrf.mxu0 }
 0x234   :  { %v1508_v24 = vadd.f32 %v2012_v23, %v1709_v58 }
 0x235   :  { %v1499_v25 = vpop.f32.mrf.mxu0 }
 0x236   :  { %1552 = vst [vmem:[#allocation8 + $0x30] sm:$0xff] %v1508_v24  ;;  %v1500_v15 = vadd.f32 %v1709_v58, %v1499_v25 }
 0x237   :  { %v2013_v18 = vpop.f32.mrf.mxu0 }
 0x238   :  { %1550 = vst [vmem:[#allocation8 + $0x20] sm:$0xff] %v1500_v15  ;;  %v1511_v26 = vadd.f32 %v2013_v18, %v1709_v58 }
 0x239   :  { %v1502_v29 = vpop.f32.mrf.mxu0 }
 0x23a   :  { %1553 = vst [vmem:[#allocation8 + $0x38] sm:$0xff] %v1511_v26  ;;  %v1503_v32 = vadd.f32 %v1709_v58, %v1502_v29 }
 0x23c   :  { %1551 = vst [vmem:[#allocation8 + $0x28] sm:$0xff] %v1503_v32 }
 0x243   :  { %v2016_v14 = vpop.f32.mrf.mxu1 }
 0x244   :  { %v1524_v22 = vadd.f32 %v2016_v14, %v1709_v58 }
 0x245   :  { %v1515_v21 = vpop.f32.mrf.mxu1 }
 0x246   :  { %1556 = vst [vmem:[#allocation8 + $0x50] sm:$0xff] %v1524_v22  ;;  %v1516_v31 = vadd.f32 %v1709_v58, %v1515_v21 }
 0x247   :  { %v2017_v28 = vpop.f32.mrf.mxu1 }
 0x248   :  { %1554 = vst [vmem:[#allocation8 + $0x40] sm:$0xff] %v1516_v31  ;;  %v1527_v34 = vadd.f32 %v2017_v28, %v1709_v58 }
 0x249   :  { %v1518_v37 = vpop.f32.mrf.mxu1 }
 0x24a   :  { %1557 = vst [vmem:[#allocation8 + $0x58] sm:$0xff] %v1527_v34  ;;  %v1519_v33 = vadd.f32 %v1709_v58, %v1518_v37 }
 0x24c   :  { %1555 = vst [vmem:[#allocation8 + $0x48] sm:$0xff] %v1519_v33 }
 0x253   :  { %v2020_v39 = vpop.f32.mrf.mxu1 }
 0x254   :  { %v1540_v53 = vadd.f32 %v2020_v39, %v1709_v58 }
 0x255   :  { %v1531_v56 = vpop.f32.mrf.mxu1 }
 0x256   :  { %1560 = vst [vmem:[#allocation8 + $0x70] sm:$0xff] %v1540_v53  ;;  %v1532_v55 = vadd.f32 %v1709_v58, %v1531_v56 }
 0x257   :  { %v2021_v42 = vpop.f32.mrf.mxu1 }
 0x258   :  { %1558 = vst [vmem:[#allocation8 + $0x60] sm:$0xff] %v1532_v55  ;;  %v1543_v35 = vadd.f32 %v2021_v42, %v1709_v58 }
 0x259   :  { %v1534_v63 = vpop.f32.mrf.mxu1 }
 0x25a   :  { %1561 = vst [vmem:[#allocation8 + $0x78] sm:$0xff] %v1543_v35  ;;  %v1535_v2 = vadd.f32 %v1709_v58, %v1534_v63 }
 0x25c   :  { %1559 = vst [vmem:[#allocation8 + $0x68] sm:$0xff] %v1535_v2 }
 0x25d   :  { %2191 = shalt.err (!%p2188_p5)
}
 0x25e   :  { %s2214_s14 = smov 128   ;;  %s2215_s15 = smov 8  }
 0x25f   :  { %1573 = dma.vmem_to_hbm [thread:$0]  %s1568_s12, 2048, %s2407_s5, [#allocation4], %s2214_s14, %s2214_s14, %s2215_s15  }
 0x260   :  { %2204 = dma.done.wait [#allocation4], 2048  }
 0x261   :  { %2205 = vsyncadd [#allocation4], 4294965248 }
 0x262   :  { %1577 = vsyncpa [#allocation3], 1 }
 0x263   :  { %1578 = vsyncpa [#allocation6], 1 }
 0x264   :  { %1579 = vsyncpa [#allocation4], 1 }

</bundles_post_ra>
